<compile_context>
chip_gen: v6e
topology: v6e:2x2x1
jax: 0.10.0
libtpu: 0.0.40
codegen_flags: <defaults>
</compile_context>

<pallas_src>
import functools

import jax
import jax.numpy as jnp
from jax.experimental import pallas as pl
from jax.experimental.pallas import tpu as pltpu


def _snakebeta_kernel(x_ref, params_ref, o_ref, *, compute_dtype):
    # x_ref, o_ref:   (Ct, Tt) in the I/O dtype
    # params_ref:     (Ct, 2)  float32: [:, 0] = alpha, [:, 1] = 1/(beta+eps)
    x = x_ref[...].astype(compute_dtype)
    params = params_ref[...]
    a = params[:, 0:1].astype(compute_dtype)      # (Ct, 1) broadcasts along lanes (T)
    inv_b = params[:, 1:2].astype(compute_dtype)  # (Ct, 1)
    s = jnp.sin(x * a)
    # SnakeBeta := x + 1/(beta + eps) * sin^2(alpha * x)
    o_ref[...] = (x + inv_b * (s * s)).astype(o_ref.dtype)


def _tpu_generation():
    """Best-effort TPU generation detection (5 / 6 / 7); defaults to 6."""
    try:
        kind = jax.devices()[0].device_kind.lower()
    except Exception:
        kind = ""
    if "v5" in kind:
        return 5
    if "v7" in kind:
        return 7
    if "v6" in kind:
        return 6
    return 6  # unknown / newer -> assume recent-generation defaults


def _pick_tiles(C, T, dtype, target_block_bytes, block_c=None, block_t=None):
    """Choose (Ct, Tt): lane-dense, (8,128)-legal, ~<= target_block_bytes per block."""
    itemsize = jnp.dtype(dtype).itemsize
    sub = max(32 // itemsize, 8)  # native sublane multiple: 8 f32, 16 bf16/f16, 32 int8

    if block_t is None:
        # Largest lane tile such that at least one native sublane-group fits the budget.
        max_t = max(target_block_bytes // (sub * itemsize), 128)
        if T <= max_t:
            block_t = T  # full extent is always legal
        else:
            base = max((max_t // 128) * 128, 128)
            block_t = base
            if T % 128 == 0:
                # Prefer a multiple of 128 that also divides T (no masked tail tile).
                units = T // 128
                best = 1
                d = 1
                while d * d <= units:
                    if units % d == 0:
                        for cand in (d, units // d):
                            if cand * 128 <= base and cand > best:
                                best = cand
                    d += 1
                block_t = best * 128
    else:
        assert block_t == T or block_t % 128 == 0, (
            f"block_t={block_t} must be a multiple of 128 or equal to T={T}")

    if block_c is None:
        max_c = max(target_block_bytes // (block_t * itemsize), sub)
        if C <= max_c:
            block_c = C  # full extent is always legal
        else:
            block_c = max((max_c // sub) * sub, sub)
    else:
        assert block_c == C or block_c % 8 == 0, (
            f"block_c={block_c} must be a multiple of 8 or equal to C={C}")

    return block_c, block_t


def snakebeta(x, alpha, beta, alpha_logscale=False, *,
              block_c=None, block_t=None, donate_x=False, precise=False):
    """SnakeBeta forward pass.

    x:     (B, C, T) float array (f32 or bf16)
    alpha: (C,) per-channel frequency parameter
    beta:  (C,) per-channel magnitude parameter
    donate_x: alias the output onto x's HBM buffer (caller must not reuse x).
    precise:  force f32 internal math even for bf16 inputs.
    """
    B, C, T = x.shape
    gen = _tpu_generation()

    # --- parameter preprocessing in float32 (wrapper-side, once) ---
    alpha32 = alpha.astype(jnp.float32)
    beta32 = beta.astype(jnp.float32)
    if alpha_logscale:
        alpha32 = jnp.exp(alpha32)
        beta32 = jnp.exp(beta32)
    inv_beta32 = 1.0 / (beta32 + 1e-9)
    params = jnp.stack([alpha32, inv_beta32], axis=-1)  # (C, 2) f32

    # --- generation-aware block byte budget ---
    if gen == 5:
        # 4 buffers * 3 MiB = 12 MiB < 16 MiB scoped default; v5e is HBM-bound anyway.
        target_bytes = 3 * 1024 * 1024
        vmem_limit = None
    else:
        # v6e/v7x: amortize the ~0.35us per-step overhead with bigger blocks.
        target_bytes = 4 * 1024 * 1024
        vmem_limit = 40 * 1024 * 1024  # headroom; v7x has 64 MiB physical per TC

    ct, tt = _pick_tiles(C, T, x.dtype, target_bytes, block_c, block_t)
    grid = (B, pl.cdiv(C, ct), pl.cdiv(T, tt))

    # --- internal compute dtype ---
    # bf16 math on v6e/v7x (sin polynomial is VALU-bound; bf16 packs 2 elem/lane).
    if (not precise) and x.dtype == jnp.bfloat16 and gen >= 6:
        compute_dtype = jnp.bfloat16
    else:
        compute_dtype = jnp.float32

    itemsize = jnp.dtype(x.dtype).itemsize
    n = B * C * T
    cost = pl.CostEstimate(
        flops=5 * n,                                   # mul, sin-arg mul, square, scale, add (approx)
        transcendentals=n,                             # one sin per element
        bytes_accessed=2 * n * itemsize + 8 * C,       # x in + y out + params
    )

    cp_kwargs = dict(dimension_semantics=("parallel", "parallel", "parallel"))
    if vmem_limit is not None:
        cp_kwargs["vmem_limit_bytes"] = vmem_limit

    return pl.pallas_call(
        functools.partial(_snakebeta_kernel, compute_dtype=compute_dtype),
        out_shape=jax.ShapeDtypeStruct((B, C, T), x.dtype),
        grid_spec=pltpu.PrefetchScalarGridSpec(
            num_scalar_prefetch=0,
            grid=grid,
            in_specs=[
                # batch dim squeezed -> kernel sees (Ct, Tt)
                pl.BlockSpec((None, ct, tt), lambda b, c, t: (b, c, t)),
                # packed params: constant along b/t -> block stays resident in VMEM
                pl.BlockSpec((ct, 2), lambda b, c, t: (c, 0)),
            ],
            out_specs=pl.BlockSpec((None, ct, tt), lambda b, c, t: (b, c, t)),
        ),
        compiler_params=pltpu.CompilerParams(**cp_kwargs),
        cost_estimate=cost,
        input_output_aliases=({0: 0} if donate_x else {}),
    )(x, params)


def snakebeta_ref(x, alpha, beta, alpha_logscale=False):
    """Pure-JAX reference mirroring the PyTorch forward (f32 internal math)."""
    alpha = alpha.astype(jnp.float32)
    beta = beta.astype(jnp.float32)
    if alpha_logscale:
        alpha = jnp.exp(alpha)
        beta = jnp.exp(beta)
    a = alpha[None, :, None]
    b = beta[None, :, None]
    xf = x.astype(jnp.float32)
    y = xf + 1.0 / (b + 1e-9) * jnp.sin(xf * a) ** 2
    return y.astype(x.dtype)


if __name__ == "__main__":
    key = jax.random.PRNGKey(0)
    k1, k2, k3, k4, k5 = jax.random.split(key, 5)

    # --- test 1: default-init SnakeBeta (alpha=beta=ones), small (B, C, T) ---
    B, C, T = 2, 4, 16
    x = jax.random.normal(k1, (B, C, T), dtype=jnp.float32)
    alpha = jnp.ones((C,), dtype=jnp.float32)
    beta = jnp.ones((C,), dtype=jnp.float32)
    out = jax.block_until_ready(snakebeta(x, alpha, beta, alpha_logscale=False))
    expected = snakebeta_ref(x, alpha, beta, alpha_logscale=False)
    assert out.shape == x.shape
    assert jnp.allclose(out, expected, atol=1e-5, rtol=1e-5)

    # --- test 2: alpha_logscale path, non-divisible C/T, explicit small tiles
    #     (exercises real (8,128) tiles and masked last blocks on C and T) ---
    B2, C2, T2 = 2, 12, 300
    x2 = jax.random.normal(k2, (B2, C2, T2), dtype=jnp.float32)
    a2 = 0.1 * jax.random.normal(k3, (C2,), dtype=jnp.float32)
    b2 = 0.1 * jax.random.normal(k4, (C2,), dtype=jnp.float32)
    out2 = jax.block_until_ready(
        snakebeta(x2, a2, b2, alpha_logscale=True, block_c=8, block_t=128))
    exp2 = snakebeta_ref(x2, a2, b2, alpha_logscale=True)
    assert out2.shape == x2.shape
    assert jnp.allclose(out2, exp2, atol=1e-5, rtol=1e-5)

    # --- test 3: bf16 I/O (uses bf16 internal math on v6e/v7x, f32 on v5e) ---
    B3, C3, T3 = 2, 16, 256
    x3 = jax.random.normal(k5, (B3, C3, T3), dtype=jnp.float32).astype(jnp.bfloat16)
    a3 = jnp.ones((C3,), dtype=jnp.float32)
    b3 = jnp.ones((C3,), dtype=jnp.float32)
    out3 = jax.block_until_ready(snakebeta(x3, a3, b3))
    exp3 = snakebeta_ref(x3, a3, b3).astype(jnp.float32)
    assert out3.dtype == jnp.bfloat16
    assert jnp.allclose(out3.astype(jnp.float32), exp3, atol=5e-2, rtol=5e-2)

    print("KERNEL_OK")
</pallas_src>

<mosaic_0001>
module attributes {stable_mosaic.version = 11 : i64} {
  func.func @_snakebeta_kernel(%arg0: i32, %arg1: i32, %arg2: i32, %arg3: memref<1x4x16xf32, #tpu.memory_space<vmem>>, %arg4: memref<4x2xf32, #tpu.memory_space<vmem>>, %arg5: memref<1x4x16xf32, #tpu.memory_space<vmem>>) attributes {dimension_semantics = [#tpu.dimension_semantics<parallel>, #tpu.dimension_semantics<parallel>, #tpu.dimension_semantics<parallel>], iteration_bounds = array<i64: 2, 1, 1>, scalar_prefetch = 0 : i64, scratch_operands = 0 : i64, tpu.core_type = #tpu.core_type<tc>, window_params = [{transform_indices = @transform_0, window_bounds = array<i64: 1, 4, 16>}, {transform_indices = @transform_1, window_bounds = array<i64: 4, 2>}, {transform_indices = @transform_2, window_bounds = array<i64: 1, 4, 16>}]} {
    %c0 = arith.constant 0 : index
    %c0_0 = arith.constant 0 : index
    %c0_1 = arith.constant 0 : index
    %0 = vector.load %arg3[%c0, %c0_0, %c0_1] : memref<1x4x16xf32, #tpu.memory_space<vmem>>, vector<1x4x16xf32>
    %1 = vector.shape_cast %0 : vector<1x4x16xf32> to vector<4x16xf32>
    %c0_2 = arith.constant 0 : index
    %c0_3 = arith.constant 0 : index
    %2 = vector.load %arg4[%c0_2, %c0_3] : memref<4x2xf32, #tpu.memory_space<vmem>>, vector<4x2xf32>
    %3 = vector.extract_strided_slice %2 {offsets = [0, 0], sizes = [4, 1], strides = [1, 1]} : vector<4x2xf32> to vector<4x1xf32>
    %4 = vector.extract_strided_slice %2 {offsets = [0, 1], sizes = [4, 1], strides = [1, 1]} : vector<4x2xf32> to vector<4x1xf32>
    %5 = vector.broadcast %3 : vector<4x1xf32> to vector<4x16xf32>
    %6 = arith.mulf %1, %5 : vector<4x16xf32>
    %7 = math.sin %6 : vector<4x16xf32>
    %8 = arith.mulf %7, %7 : vector<4x16xf32>
    %9 = vector.broadcast %4 : vector<4x1xf32> to vector<4x16xf32>
    %10 = arith.mulf %9, %8 : vector<4x16xf32>
    %11 = arith.addf %1, %10 : vector<4x16xf32>
    %c0_4 = arith.constant 0 : index
    %c0_5 = arith.constant 0 : index
    %c0_6 = arith.constant 0 : index
    %12 = vector.load %arg5[%c0_4, %c0_5, %c0_6] : memref<1x4x16xf32, #tpu.memory_space<vmem>>, vector<1x4x16xf32>
    %13 = vector.shape_cast %12 : vector<1x4x16xf32> to vector<4x16xf32>
    %14 = vector.shape_cast %11 : vector<4x16xf32> to vector<1x4x16xf32>
    tpu.vector_store %arg5[%c0_4, %c0_5, %c0_6], %14 {strides = array<i32>} : memref<1x4x16xf32, #tpu.memory_space<vmem>>, vector<1x4x16xf32>,
    return
  }
  func.func @transform_0(%arg0: i32, %arg1: i32, %arg2: i32) -> (i32, i32, i32) {
    %c0_i32 = arith.constant 0 : i32
    return %arg0, %arg1, %arg2 : i32, i32, i32
  }
  func.func @transform_1(%arg0: i32, %arg1: i32, %arg2: i32) -> (i32, i32) {
    %c0_i32 = arith.constant 0 : i32
    %c0_i32_0 = arith.constant 0 : i32
    return %arg1, %c0_i32 : i32, i32
  }
  func.func @transform_2(%arg0: i32, %arg1: i32, %arg2: i32) -> (i32, i32, i32) {
    %c0_i32 = arith.constant 0 : i32
    return %arg0, %arg1, %arg2 : i32, i32, i32
  }
}

</mosaic_0001>

<bundles_post_ra>
// kernel: tpu_custom_call.1
= control target key start
LH: loop header
LB: loop body
LE: loop exit
PB: predicated region body
PF: predicated region fallthrough
CT: control target
= control target key end

     0   :  { %7 = vsyncpa [#allocation3], 0  ;;  %s841_s0 = inlined_call_operand.hbm [shape: f32[2,4,16], index: 0, kind: input, shape index: {}]   ;;  %s842_s1 = inlined_call_operand.vmem [shape: f32[4,2], index: 1, kind: input, shape index: {}]   ;;  %s843_s2 = inlined_call_operand.hbm [shape: f32[2,4,16], index: 2, kind: output, shape index: {}]  }
   0x1   :  { %9 = vsyncpa [#allocation3 + $0x1], 0 }
   0x2   :  { %10 = vsyncpa [#allocation4], 0 }
   0x3   :  { %12 = vsyncpa [#allocation4 + $0x1], 0  ;;  %s675_s9 = smov 0   ;;  %s677_s10 = smov 0  }
   0x4   :  { %s679_s11 = smov 0   ;;  %s681_s12 = smov 0  }
   0x5   :  { %s683_s13 = smov 0   ;;  %s685_s14 = smov 0  }
   0x6 LB: > { %s442_s15 = sadd.s32 4294967295, %s648_s14   ;;  %s443_s16 = sadd.s32 4294967294, %s648_s14   ;;  %s648_s14 = sphi %s685_s14, %s18_s14   ;;  %s644_s13 = sphi %s683_s13, %s855_s13   ;;  %s640_s12 = sphi %s681_s12, %s854_s12   ;;  %s636_s11 = sphi %s679_s11, %s853_s11   ;;  %s632_s10 = sphi %s677_s10, %s852_s10   ;;  %s628_s9 = sphi %s675_s9, %s851_s9  }
   0x7   : > { %s37_s17 = sadd.s32 1, %s644_s13  ;;  %s48_s18 = sadd.s32 1, %s636_s11 }
   0x8   : > { %p39_p0 = scmp.ge.s32.totalorder %s37_s17, 2  ;;  %p55_p1 = scmp.ne.s32.totalorder %s636_s11, %s632_s10 }
   0x9   : > { %p56_p2 = scmp.eq.s32.totalorder %s648_s14, 0  ;;  %p61_p3 = scmp.ne.s32.totalorder %s632_s10, %s628_s9 }
   0xa   : > { %s857_s17 = smov (%p39_p0, %s37_s17), 0  ;;  %p62_p5 = scmp.eq.s32.totalorder %s442_s15, 0 }
   0xb   : > { %p716_p4 = por %p56_p2, %p55_p1  ;;  %s41_s20 = ssub.s32 %s644_s13, %s857_s17 }
   0xc   : > { %p115_p6 = scmp.eq.s32.totalorder %s442_s15, 1  ;;  %p46_p7 = scmp.eq.s32.totalorder %s41_s20, 0 }
   0xd   : > { %p722_p8 = por %p62_p5, %p61_p3  ;;  %p121_p10 = scmp.eq.s32.totalorder %s443_s16, 1 }
   0xe   : > { %p726_p9 = por %p115_p6, %p55_p1  ;;  %p476_p13 = scmp.lt.s32.totalorder %s648_s14, 2 }
   0xf   : > { %s731_s23 = scalar_select %p46_p7, %s636_s11, %s48_s18  }
  0x10   : > { %p733_p11 = por %p121_p10, %p61_p3  ;;  %s148_s25 = sand.u32 1, %s636_s11  }
  0x11   : > { %s447_s26 = sshll.u32 %s148_s25, 2  ;;  %s448_s27 = sshll.u32 %s644_s13, 6 }
  0x12   : > { %s847_s24 = scalar_select %p733_p11, 1, 0 }
  0x13   : > { %s159_s30 = scalar_lea.hbm %s841_s0, %s448_s27  ;;  %s152_s3 = scalar_lea.vmem [#allocation2], %s447_s26 }
  0x14   : > { %s161_s4 = sshll.u32 %s152_s3, 4  ;;  %p746_p0 = pnand %p476_p13, %p716_p4  ;;  %s162_s4 = int_to_ptr.vmem [resolvable:$true] %s161_s4 }
  0x15   : > { %p449_p1 = scmp.ge.s32.totalorder %s648_s14, 1  ;;  %p166_p2 = scmp.lt.s32.totalorder %s648_s14, 3 }
  0x16   : > { %s149_s6 = scalar_lea.sflag [#allocation3], %s148_s25  ;;  %p542_p3 = pneg %p746_p0 }
  0x17   : > { %s553_s7 = scalar_lea.vmem %s162_s4, 64  ;;  %s650_s8 = smov [#allocation2]  }
  0x18   : > { %p554_p5 = scmp.ne.s32.totalorder %s162_s4, %s553_s7  ;;  %s558_s15 = sshll.u32 %s650_s8, 4  ;;  %s559_s15 = int_to_ptr.vmem [resolvable:$false] %s558_s15 }
  0x19   : > { %s560_s16 = scalar_lea.vmem %s559_s15, 128  ;;  %p561_p10 = scmp.lt.s32.totalorder %s162_s4, %s559_s15 }
  0x1a   : > { %p556_p6 = pnand %p554_p5, %p542_p3  ;;  %p562_p12 = scmp.lt.s32.totalorder %s560_s16, %s553_s7 }
  0x1c   : > { %p557_p7 = pneg %p556_p6  ;;  %p563_p4 = por %p562_p12, %p561_p10 }
  0x1e   : > { %p564_p13 = pnand %p563_p4, %p557_p7 }
  0x20   : > { %567 = shalt.err (!%p564_p13)
}
  0x21   : > { %471 = dma.hbm_to_vmem [thread:$0]  (!%p746_p0), %s159_s30, 64, %s162_s4, %s149_s6  }
  0x22   : > { %p167_p11 = pnand %p449_p1, %p166_p2 }
  0x23   : > { %s761_s18 = sand.u32 (!%p167_p11), 1, %s632_s10  }
  0x24   : > { %170 = sbr.rel (%p167_p11) target bundleno = 271 (0x10f), region = 28  ;;  %s450_s19 = sshll.u32 (!%p167_p11), %s761_s18, 2 }
  0x25   : > { %s173_s20 = scalar_lea.sflag (!%p167_p11), [#allocation3], %s761_s18  ;;  %s176_s25 = scalar_lea.vmem (!%p167_p11), [#allocation2], %s450_s19 }
  0x29   : > { %619 = dma.done.wait (%p722_p8), %s173_s20, 64  }
  0x2a   : > { %621 = vsyncadd (%p722_p8), %s173_s20, 4294967232  ;;  %v651_v0 = vmov 0   ;;  %v206_v1 = vld [vmem:[%s842_s1] sm:$0xf]  ;;  %v652_v2 = vmov 1   ;;  %s457_s21 = sshll.u32 %s640_s12, 6 }
  0x2b   : > { %534 = vset.pattern.permute.xlu0 %v651_v0  ;;  %v774_v3 = vld [vmem:[%s176_s25] sm:$0xf]  ;;  %v653_v16 = vmov 683565275   ;;  %v654_v18 = vmov 2475754826   ;;  %s340_s4 = scalar_lea.hbm %s843_s2, %s457_s21 }
  0x2c   : > { %209 = vperm.xlu0 %534, %v206_v1   ;;  %v655_v21 = vmov 2131351028   ;;  %v656_v24 = vmov 2102212464   ;;  %v657_v27 = vmov 920167782  }
  0x2d   : > { %v658_v30 = vmov 1326507024   ;;  %s200_s28 = scalar_lea.vmem [#allocation5], %s450_s19  ;;  %vm324_vm13 = vcmask 125952   ;;  %s327_s5 = scalar_lea.sflag [#allocation4], %s761_s18 }
  0x2e   : > { %s342_s29 = sshll.u32 %s200_s28, 4  ;;  %s659_s12 = smov [#allocation5]   ;;  %s343_s29 = int_to_ptr.vmem [resolvable:$true] %s342_s29 }
  0x2f   : > { %s568_s6 = scalar_lea.vmem %s343_s29, 64  ;;  %s572_s7 = sshll.u32 %s659_s12, 4  ;;  %s573_s7 = int_to_ptr.vmem [resolvable:$false] %s572_s7 }
  0x30   : > { %535 = vset.pattern.permute.xlu0 %v652_v2  ;;  %p569_p8 = scmp.ne.s32.totalorder %s343_s29, %s568_s6  ;;  %s574_s8 = scalar_lea.vmem %s573_s7, 128 }
  0x31   : > { %319 = vperm.xlu0 %535, %v206_v1   ;;  %p575_p0 = scmp.lt.s32.totalorder %s343_s29, %s573_s7  ;;  %p576_p1 = scmp.lt.s32.totalorder %s574_s8, %s568_s6 }
  0x32   : > { %p570_p11 = pnand %p569_p8, %p726_p9 }
  0x33   : > { %p577_p2 = por %p576_p1, %p575_p0 }
  0x34   : > { %p571_p12 = pneg %p570_p11 }
  0x36   : > { %p578_p3 = pnand %p577_p2, %p571_p12 }
  0xa7   : > { %v210_v4 = vpop.permute.xlu0 %209 }
  0xa8   : > { %v777_v5 = vmul.f32 %v210_v4, %v774_v3 }
  0xaa   : > { %v216_v6 = vand.u32 2139095040, %v777_v5  ;;  %v213_v10 = vand.u32 2147483647, %v777_v5  ;;  %vm215_vm7 = vcmp.lt.s32.totalorder %v777_v5, 0  ;;  %vm305_vm12 = vweird.f32 %v777_v5 }
  0xac   : > { %v217_v7 = vshrl.u32 %v216_v6, 23  ;;  %v220_v13 = vand.u32 8388607, %v213_v10  ;;  %vm214_vm8 = vcmp.le.f32.partialorder %v213_v10, 0.7853982 }
  0xae   : > { %v452_v8 = vadd.s32 4294967169, %v217_v7  ;;  %v221_v32 = vor.u32 8388608, %v220_v13 }
  0xb0   : > { %v223_v9 = vadd.s32 1, %v452_v8  ;;  %v261_v46 = vshll.u32 %v221_v32, 8 }
  0xb2   : > { %vm224_vm0 = vcmp.gt.s32.totalorder %v223_v9, 0 }
  0xb3   : > { %v225_v11 = vsel %vm224_vm0, %v223_v9, 0 }
  0xb4   : > { %v227_v12 = vand.u32 31, %v225_v11  ;;  %v226_v15 = vshrl.u32 %v225_v11, 5 }
  0xb6   : > { %v228_v14 = vsub.s32 32, %v227_v12  ;;  %v230_v17 = vshll.u32 %v653_v16, %v227_v12  ;;  %v233_v19 = vshll.u32 %v654_v18, %v227_v12  ;;  %v236_v23 = vshll.u32 %v655_v21, %v227_v12 }
  0xb7   : > { %v239_v26 = vshll.u32 %v656_v24, %v227_v12  ;;  %v242_v29 = vshll.u32 %v657_v27, %v227_v12  ;;  %vm245_vm1 = vcmp.lt.s32.totalorder %v226_v15, 1  ;;  %vm248_vm2 = vcmp.lt.s32.totalorder %v226_v15, 4 }
  0xb8   : > { %v231_v20 = vshrl.u32 %v654_v18, %v228_v14  ;;  %v234_v22 = vshrl.u32 %v655_v21, %v228_v14  ;;  %v237_v25 = vshrl.u32 %v656_v24, %v228_v14  ;;  %v240_v28 = vshrl.u32 %v657_v27, %v228_v14 }
  0xb9   : > { %v243_v31 = vshrl.u32 %v658_v30, %v228_v14  ;;  %v229_v41 = vshrl.u32 %v653_v16, %v228_v14  ;;  %vm247_vm3 = vcmp.lt.s32.totalorder %v226_v15, 3  ;;  %vm246_vm4 = vcmp.lt.s32.totalorder %v226_v15, 2 }
  0xba   : > { %v232_v33 = vor.u32 %v231_v20, %v230_v17  ;;  %v235_v34 = vor.u32 %v234_v22, %v233_v19  ;;  %v238_v35 = vor.u32 %v237_v25, %v236_v23  ;;  %v241_v36 = vor.u32 %v240_v28, %v239_v26 }
  0xbb   : > { %v244_v37 = vor.u32 %v243_v31, %v242_v29 }
  0xbc   : > { %v250_v38 = vsel %vm248_vm2, %v238_v35, 2102212464  ;;  %v253_v39 = vsel %vm245_vm1, %v232_v33, %v235_v34  ;;  %v257_v40 = vsel %vm245_vm1, %v235_v34, %v238_v35  ;;  %v254_v42 = vsel %vm248_vm2, %v241_v36, 920167782 }
  0xbd   : > { %v258_v43 = vsel %vm248_vm2, %v244_v37, 1326507024  ;;  %v255_v44 = vsel %vm247_vm3, %v238_v35, %v254_v42  ;;  %v249_v47 = vsel %vm245_vm1, %v229_v41, %v232_v33  ;;  %v251_v48 = vsel %vm247_vm3, %v235_v34, %v250_v38  ;;  %v320_v34 = vpop.permute.xlu0 %319 }
  0xbe   : > { %v259_v45 = vsel %vm247_vm3, %v241_v36, %v258_v43  ;;  %v256_v49 = vsel %vm246_vm4, %v253_v39, %v255_v44  ;;  %v252_v55 = vsel %vm246_vm4, %v249_v47, %v251_v48 }
  0xbf   : > { %v260_v50 = vsel %vm246_vm4, %v257_v40, %v259_v45  ;;  %v786_v53 = vmul.u32.u64.low %v261_v46, %v256_v49  ;;  %v787_v54 = vmul.u32.u64.high %v261_v46, %v256_v49, %v786_v53  ;;  %v268_v57 = vmul.u32 %v261_v46, %v252_v55 }
  0xc0   : > { %v783_v51 = vmul.u32.u64.low %v261_v46, %v260_v50  ;;  %v784_v52 = vmul.u32.u64.high %v261_v46, %v260_v50, %v783_v51 }
  0xc1   : > { %v271_v56 = vadd.s32 1, %v787_v54 }
  0xc2   : > { %vm270_vm5 = vc.u32 %v784_v52, %v786_v53  ;;  %v269_v7 = vadd.s32 %v786_v53, %v784_v52 }
  0xc3   : > { %v272_v58 = vsel %vm270_vm5, %v271_v56, %v787_v54 }
  0xc4   : > { %v273_v59 = vadd.s32 %v272_v58, %v268_v57 }
  0xc6   : > { %v274_v60 = vadd.s32 536870912, %v273_v59 }
  0xc8   : > { %v275_v61 = vshrl.u32 %v274_v60, 30 }
  0xca   : > { %v276_v62 = vshll.u32 %v275_v61, 30  ;;  %v299_v21 = vsub.s32 4, %v275_v61 }
  0xcc   : > { %v277_v63 = vsub.s32 %v273_v59, %v276_v62  ;;  %v300_v24 = vsel %vm215_vm7, %v299_v21, %v275_v61 }
  0xcd   : > { %v302_v25 = vsel %vm214_vm8, 0, %v300_v24 }
  0xce   : > { %v279_v0 = vsub.s32 0, %v277_v63  ;;  %v306_v26 = vadd.s32 3, %v302_v25 }
  0xd0   : > { %v453_v1 = vmin.u32 %v279_v0, %v277_v63  ;;  %v307_v27 = vand.u32 3, %v306_v26 }
  0xd2   : > { %v281_v2 = vclz %v453_v1  ;;  %vm312_vm9 = vcmp.eq.s32.totalorder %v307_v27, 2  ;;  %vm309_vm10 = vcmp.eq.s32.totalorder %v307_v27, 0  ;;  %vm308_vm11 = vcmp.lt.s32.totalorder %v307_v27, 2 }
  0xd4   : > { %v454_v4 = vadd.s32 4294967294, %v281_v2 }
  0xd6   : > { %vm455_vm6 = vcmp.lt.s32.totalorder %v454_v4, 0 }
  0xd7   : > { %v284_v6 = vsel %vm455_vm6, 0, %v454_v4 }
  0xd8   : > { %v285_v8 = vsub.s32 32, %v284_v6  ;;  %v289_v9 = vsub.s32 4294967266, %v284_v6  ;;  %v286_v11 = vshll.u32 %v277_v63, %v284_v6 }
  0xda   : > { %v287_v12 = vshrl.u32 %v269_v7, %v285_v8  ;;  %v290_v13 = vadd.s32 127, %v289_v9 }
  0xdc   : > { %v288_v14 = vor.u32 %v287_v12, %v286_v11  ;;  %v291_v15 = vshll.u32 %v290_v13, 23 }
  0xde   : > { %v292_v16 = vor.u32 4788187, %v291_v15  ;;  %v295_v18 = vcvt.s32.f32 %v288_v14 }
  0xe0   : > { %v293_v17 = vand.u32 2147483647, %v292_v16 }
  0xe2   : > { %v296_v19 = vmul.f32 %v295_v18, %v293_v17 }
  0xe4   : > { %v297_v20 = vxor.u32 2147483648, %v296_v19 }
  0xe6   : > { %v298_v22 = vsel %vm215_vm7, %v297_v20, %v296_v19 }
  0xe7   : > { %v301_v23 = vsel %vm214_vm8, %v777_v5, %v298_v22 }
  0xe8   : > { %536 = vcosq.f32 %v301_v23 }
  0xe9   : > { %538 = vsinq.f32 %v301_v23 }
  0xf5   : > { %v537_v28 = vpop.eup %536 }
  0xf6   : > { %v539_v29 = vpop.eup %538  ;;  %v313_v30 = vxor.u32 2147483648, %v537_v28 }
  0xf7   : > { %v310_v31 = vxor.u32 2147483648, %v539_v29 }
  0xf8   : > { %v314_v32 = vsel %vm312_vm9, %v313_v30, %v539_v29 }
  0xf9   : > { %v311_v10 = vsel %vm309_vm10, %v537_v28, %v310_v31 }
  0xfa   : > { %v315_v33 = vsel %vm308_vm11, %v311_v10, %v314_v32 }
  0xfb   : > { %v316_v35 = vsel %vm305_vm12, nan, %v315_v33 }
  0xfc   : > { %v317_v36 = vmul.f32 %v316_v35, %v316_v35 }
  0xfe   : > { %v322_v37 = vmul.f32 %v320_v34, %v317_v36 }
 0x100   : > { %v323_v38 = vadd.f32 %v322_v37, %v774_v3 }
 0x102   : > { %325 = vst.msk [vmem:[%s200_s28] sm:$0xf] %vm324_vm13, %v323_v38 }
 0x103   : > { %581 = shalt.err (!%p578_p3)
}
 0x104   : > { %s582_s15 = scalar_lea.hbm %s340_s4, 64  ;;  %s586_s19 = scalar_lea.hbm %s843_s2, 128 }
 0x105   : > { %p583_p5 = scmp.ne.s32.totalorder %s340_s4, %s582_s15  ;;  %p587_p10 = scmp.lt.s32.totalorder %s340_s4, %s843_s2 }
 0x106   : > { %p588_p4 = scmp.lt.s32.totalorder %s586_s19, %s582_s15 }
 0x107   : > { %p584_p6 = pnand %p583_p5, %p726_p9 }
 0x108   : > { %p589_p13 = por %p588_p4, %p587_p10 }
 0x109   : > { %p585_p7 = pneg %p584_p6 }
 0x10b   : > { %p590_p8 = pnand %p589_p13, %p585_p7 }
 0x10d   : > { %593 = shalt.err (!%p590_p8)
}
 0x10e   : > { %466 = dma.vmem_to_hbm [thread:$0]  (%p726_p9), %s343_s29, 64, %s340_s4, %s327_s5  }
 0x10f PF: > { %s354_s26 = sand.u32 1, %s628_s9   ;;  %p849_p11 = scmp.ne.s32.totalorder %s847_s24, 0 }
 0x110   : > { %p850_p12 = scmp.ge.s32.totalorder %s648_s14, 2  ;;  %s355_s27 = scalar_lea.sflag [#allocation4], %s354_s26 }
 0x112   : > { %p473_p0 = pnand %p850_p12, %p849_p11 }
 0x114   : > { %p474_p1 = pneg %p473_p0 }
 0x116   : > { %623 = dma.done.wait (%p474_p1), %s355_s27, 64  }
 0x117   : > { %625 = vsyncadd (%p474_p1), %s355_s27, 4294967232  ;;  %s18_s14 = sadd.s32 1, %s648_s14   ;;  %s851_s9 = smov %s632_s10 }
 0x118   : > { %p15_p2 = scmp.ge.s32.totalorder %s18_s14, 4   ;;  %s852_s10 = smov %s636_s11 }
 0x119   : > { %s853_s11 = smov %s731_s23  ;;  %s854_s12 = smov %s644_s13 }
 0x11a   : > { %s855_s13 = smov %s857_s17  ;;  %17 = sbr.rel (!%p15_p2) target bundleno = 6 (0x6), region = 76 }
 0x11f   :  { %360 = vsyncpa [#allocation3], 1 }
 0x120   :  { %362 = vsyncpa [#allocation3 + $0x1], 1 }
 0x121   :  { %363 = vsyncpa [#allocation4], 1 }
 0x122   :  { %365 = vsyncpa [#allocation4 + $0x1], 1 }

</bundles_post_ra>
